<compile_context>
chip_gen: v7x
topology: tpu7x:2x2x1
jax: 0.10.0
libtpu: 0.0.40
codegen_flags: <defaults>
</compile_context>

<pallas_src>
import functools

import jax
import jax.numpy as jnp
from jax import lax
from jax.experimental import pallas as pl
from jax.experimental.pallas import tpu as pltpu

_LANE = 128
_SUBLANE = 8


# --------------------------------------------------------------------------
# Sizing helpers (generation-aware)
# --------------------------------------------------------------------------
def _round_up(x, m):
    return ((x + m - 1) // m) * m


def _vmem_capacity_bytes():
    try:
        info = pltpu.get_tpu_info()
        cap = getattr(info, "vmem_capacity_bytes", None)
        if cap:
            return int(cap)
    except Exception:
        pass
    return 64 * 1024 * 1024  # conservative (v7x-sized) fallback


def _total_vmem_budget():
    # Leave ~30% headroom for Mosaic internal scratch / pipeline metadata.
    return int(_vmem_capacity_bytes() * 0.70)


def _vmem_limit(need_bytes):
    cap = _vmem_capacity_bytes()
    # Never clamp below what the kernel actually allocates.
    return int(min(cap, max(need_bytes + (8 << 20), 32 << 20)))


def _fused_fits(m_pad, itemsize, n_big_buffers, total_budget):
    """Can we hold n_big_buffers x (m_pad, m_pad) f32 plus one 128-wide
    double-buffered feature tile in VMEM?"""
    fixed = n_big_buffers * m_pad * m_pad * 4
    return fixed + 2 * m_pad * _LANE * itemsize <= total_budget


def _pick_tk(k, bytes_per_k, budget):
    """Largest K tile (multiple of 128, or == k) fitting `budget` bytes.
    Prefers a tile that divides k exactly so no tail masking is needed."""
    if k <= _LANE:
        return k                                  # single full-K block
    max_tk = max(_LANE, (budget // max(bytes_per_k, 1)) // _LANE * _LANE)
    if max_tk >= k:
        return k                                  # one block covers all of K
    if k % _LANE == 0:
        lo = max(_LANE, (max_tk // 2 // _LANE) * _LANE)
        for cand in range(max_tk, lo - 1, -_LANE):
            if k % cand == 0:
                return cand
    return max_tk                                 # tail masked in-kernel


def _masked_tile(f, kk, row0, *, m, k, tk, mask_rows, mask_cols):
    """Zero out rows >= m and columns >= k of a streamed feature tile."""
    if not (mask_rows or mask_cols):
        return f
    valid = None
    if mask_rows:
        rows = lax.broadcasted_iota(jnp.int32, f.shape, 0) + row0
        valid = rows < m
    if mask_cols:
        cols = lax.broadcasted_iota(jnp.int32, f.shape, 1) + kk * tk
        cvalid = cols < k
        valid = cvalid if valid is None else jnp.logical_and(valid, cvalid)
    return jnp.where(valid, f, jnp.zeros_like(f))


# --------------------------------------------------------------------------
# Kernels
# --------------------------------------------------------------------------
def _gram_kernel(f_ref, g_ref, acc_ref, *, m, k, tk, inv_denom,
                 mask_rows, mask_cols):
    """K-tiled Gram: G = F @ F^T accumulated in a persistent f32 VMEM scratch."""
    kk = pl.program_id(0)

    @pl.when(kk == 0)
    def _init():
        acc_ref[...] = jnp.zeros_like(acc_ref)

    f = _masked_tile(f_ref[...], kk, 0, m=m, k=k, tk=tk,
                     mask_rows=mask_rows, mask_cols=mask_cols)
    # Contraction ((1,),(1,)) uses the MXU's transposed-RHS operand path;
    # keep native dtype (bf16 fast path), accumulate in f32.
    acc_ref[...] += lax.dot_general(
        f, f, (((1,), (1,)), ((), ())), preferred_element_type=jnp.float32)

    @pl.when(kk == pl.num_programs(0) - 1)
    def _finish():
        g_ref[...] = acc_ref[...] * inv_denom


def _gram_tiled_kernel(fi_ref, fj_ref, g_ref, acc_ref, *, m, k, tm, tk,
                       inv_denom, mask_rows, mask_cols):
    """M-tiled Gram for large N*C: grid (i, j, kk); (tm, tm) accumulator."""
    i = pl.program_id(0)
    j = pl.program_id(1)
    kk = pl.program_id(2)

    @pl.when(kk == 0)
    def _init():
        acc_ref[...] = jnp.zeros_like(acc_ref)

    fi = _masked_tile(fi_ref[...], kk, i * tm, m=m, k=k, tk=tk,
                      mask_rows=mask_rows, mask_cols=mask_cols)
    fj = _masked_tile(fj_ref[...], kk, j * tm, m=m, k=k, tk=tk,
                      mask_rows=mask_rows, mask_cols=mask_cols)
    acc_ref[...] += lax.dot_general(
        fi, fj, (((1,), (1,)), ((), ())), preferred_element_type=jnp.float32)

    @pl.when(kk == pl.num_programs(2) - 1)
    def _finish():
        g_ref[...] = acc_ref[...] * inv_denom
    # TODO(synk): exploit Gram symmetry (skip j<i tiles) for compute-bound shapes.


def _style_loss_kernel(f_ref, tgt_hbm_ref, loss_ref, acc_ref, tgt_vmem_ref,
                       tgt_sem, *, m, k, tk, inv_denom, inv_count,
                       mask_rows, mask_cols):
    """Fused Gram + MSE: scalar loss to SMEM; Gram never touches HBM.

    The constant target Gram stays in HBM (pl.ANY) and is DMA'd ONCE into a
    VMEM scratch (started at step 0, awaited in the finalize step) instead of
    being a double-buffered pipelined input."""
    kk = pl.program_id(0)

    @pl.when(kk == 0)
    def _init():
        acc_ref[...] = jnp.zeros_like(acc_ref)
        pltpu.make_async_copy(tgt_hbm_ref, tgt_vmem_ref, tgt_sem).start()

    f = _masked_tile(f_ref[...], kk, 0, m=m, k=k, tk=tk,
                     mask_rows=mask_rows, mask_cols=mask_cols)
    acc_ref[...] += lax.dot_general(
        f, f, (((1,), (1,)), ((), ())), preferred_element_type=jnp.float32)

    @pl.when(kk == pl.num_programs(0) - 1)
    def _finish():
        pltpu.make_async_copy(tgt_hbm_ref, tgt_vmem_ref, tgt_sem).wait()
        diff = acc_ref[...] * inv_denom - tgt_vmem_ref[...]
        # Padded rows/cols are exactly zero in both Grams -> no contribution.
        loss_ref[0] = jnp.sum(diff * diff) * inv_count


# --------------------------------------------------------------------------
# Cached builders (one compile per (shape, dtype))
# --------------------------------------------------------------------------
@functools.lru_cache(maxsize=None)
def _gram_callable(shape, dtype_name, force_tiled=False, tm_override=None,
                   tk_cap=None):
    """Returns a jitted fn: (N,C,H,W) features -> zero-padded Gram matrix."""
    n, c, h, w = shape
    m, k = n * c, h * w
    itemsize = jnp.dtype(dtype_name).itemsize
    total = _total_vmem_budget()
    inv_denom = 1.0 / float(n * c * h * w)
    m_pad = _round_up(m, _SUBLANE)

    if (not force_tiled) and _fused_fits(m_pad, itemsize, 3, total):
        # --- K-tiled, single (m_pad, m_pad) accumulator ---
        fixed = 3 * m_pad * m_pad * 4            # acc + (conservatively) 2x out
        tk = _pick_tk(k, 2 * m_pad * itemsize, total - fixed)
        if tk_cap:
            tk = min(tk, tk_cap)
        grid_k = pl.cdiv(k, tk)
        mask_rows = m_pad != m
        mask_cols = (k % tk) != 0
        need = fixed + 2 * m_pad * tk * itemsize
        kernel = functools.partial(
            _gram_kernel, m=m, k=k, tk=tk, inv_denom=inv_denom,
            mask_rows=mask_rows, mask_cols=mask_cols)
        call = pl.pallas_call(
            kernel,
            out_shape=jax.ShapeDtypeStruct((m_pad, m_pad), jnp.float32),
            grid=(grid_k,),
            in_specs=[pl.BlockSpec((m_pad, tk), lambda kk: (0, kk))],
            out_specs=pl.BlockSpec((m_pad, m_pad), lambda kk: (0, 0)),
            scratch_shapes=[pltpu.VMEM((m_pad, m_pad), jnp.float32)],
            compiler_params=pltpu.CompilerParams(
                dimension_semantics=("arbitrary",),
                vmem_limit_bytes=_vmem_limit(need)),
            cost_estimate=pl.CostEstimate(
                flops=int(2 * m_pad * m_pad * k), transcendentals=0,
                bytes_accessed=int(m * k * itemsize + m_pad * m_pad * 4)),
        )

        def fn(x):
            # (N,C,H,W) -> (N*C, H*W) is a free, contiguous reshape (no copy).
            return call(x.reshape(m, k))

        return jax.jit(fn)

    # --- M-tiled path for large N*C (required on v7x's 64 MiB VMEM) ---
    tm = tm_override or 256
    tm = max(_LANE, (tm // _LANE) * _LANE)       # output tile lane constraint
    m_pad_t = _round_up(m, tm)
    gm = m_pad_t // tm
    fixed = 3 * tm * tm * 4                      # acc + 2x output buffer
    tk = _pick_tk(k, 4 * tm * itemsize, total - fixed)
    if tk_cap:
        tk = min(tk, tk_cap)
    grid_k = pl.cdiv(k, tk)
    mask_rows = m_pad_t != m
    mask_cols = (k % tk) != 0
    need = fixed + 4 * tm * tk * itemsize
    kernel = functools.partial(
        _gram_tiled_kernel, m=m, k=k, tm=tm, tk=tk, inv_denom=inv_denom,
        mask_rows=mask_rows, mask_cols=mask_cols)
    call = pl.pallas_call(
        kernel,
        out_shape=jax.ShapeDtypeStruct((m_pad_t, m_pad_t), jnp.float32),
        grid=(gm, gm, grid_k),
        in_specs=[pl.BlockSpec((tm, tk), lambda i, j, kk: (i, kk)),
                  pl.BlockSpec((tm, tk), lambda i, j, kk: (j, kk))],
        out_specs=pl.BlockSpec((tm, tm), lambda i, j, kk: (i, j)),
        scratch_shapes=[pltpu.VMEM((tm, tm), jnp.float32)],
        compiler_params=pltpu.CompilerParams(
            # i/j parallel -> usable by v7x's second TensorCore.
            dimension_semantics=("parallel", "parallel", "arbitrary"),
            vmem_limit_bytes=_vmem_limit(need)),
        cost_estimate=pl.CostEstimate(
            flops=int(2 * m_pad_t * m_pad_t * k), transcendentals=0,
            bytes_accessed=int(2 * gm * m * k * itemsize
                               + m_pad_t * m_pad_t * 4)),
    )

    def fn(x):
        feats = x.reshape(m, k)
        return call(feats, feats)

    return jax.jit(fn)


@functools.lru_cache(maxsize=None)
def _loss_callable(shape, dtype_name):
    """Returns a jitted fn: (features, padded_target_gram) -> scalar MSE loss."""
    n, c, h, w = shape
    m, k = n * c, h * w
    itemsize = jnp.dtype(dtype_name).itemsize
    total = _total_vmem_budget()
    m_pad = _round_up(m, _SUBLANE)
    inv_denom = 1.0 / float(n * c * h * w)
    inv_count = 1.0 / float(m * m)

    if _fused_fits(m_pad, itemsize, 2, total):
        # --- Fused Gram + MSE, scalar-only output ---
        fixed = 2 * m_pad * m_pad * 4            # acc + single target copy
        tk = _pick_tk(k, 2 * m_pad * itemsize, total - fixed)
        grid_k = pl.cdiv(k, tk)
        mask_rows = m_pad != m
        mask_cols = (k % tk) != 0
        need = fixed + 2 * m_pad * tk * itemsize
        kernel = functools.partial(
            _style_loss_kernel, m=m, k=k, tk=tk, inv_denom=inv_denom,
            inv_count=inv_count, mask_rows=mask_rows, mask_cols=mask_cols)
        call = pl.pallas_call(
            kernel,
            out_shape=jax.ShapeDtypeStruct((1,), jnp.float32),
            grid=(grid_k,),
            in_specs=[pl.BlockSpec((m_pad, tk), lambda kk: (0, kk)),
                      pl.BlockSpec(memory_space=pl.ANY)],   # target stays in HBM
            out_specs=pl.BlockSpec(memory_space=pltpu.MemorySpace.SMEM),
            scratch_shapes=[pltpu.VMEM((m_pad, m_pad), jnp.float32),  # Gram acc
                            pltpu.VMEM((m_pad, m_pad), jnp.float32),  # target copy
                            pltpu.SemaphoreType.DMA],
            compiler_params=pltpu.CompilerParams(
                dimension_semantics=("arbitrary",),
                vmem_limit_bytes=_vmem_limit(need)),
            cost_estimate=pl.CostEstimate(
                flops=int(2 * m_pad * m_pad * k), transcendentals=0,
                bytes_accessed=int(m * k * itemsize + m_pad * m_pad * 4 + 4)),
        )

        def fn(x, target_padded):
            return call(x.reshape(m, k), target_padded)[0]

        return jax.jit(fn)

    # Fallback for very large N*C: M-tiled Gram kernel + tiny MSE in XLA
    # (the extra M_pad^2 f32 writeback is negligible vs. feature traffic).
    gram_fn = _gram_callable(shape, dtype_name, False, None, None)

    def fn(x, target_padded):
        g = gram_fn(x)
        diff = g[:m, :m] - target_padded[:m, :m]
        return jnp.sum(diff * diff) * inv_count

    return jax.jit(fn)


# --------------------------------------------------------------------------
# Public API (mirrors the PyTorch module)
# --------------------------------------------------------------------------
def gram_matrix(x, *, _force_tiled=False, _tm=None, _tk_cap=None):
    """(N, C, H, W) -> (N*C, N*C) Gram matrix divided by N*C*H*W."""
    shape = tuple(int(s) for s in x.shape)
    n, c, _, _ = shape
    m = n * c
    fn = _gram_callable(shape, jnp.dtype(x.dtype).name,
                        _force_tiled, _tm, _tk_cap)
    return fn(x)[:m, :m]


class StyleLoss:
    """JAX/Pallas port of the PyTorch StyleLoss module (forward pass)."""

    def __init__(self, target_feature):
        shape = tuple(int(s) for s in target_feature.shape)
        n, c, _, _ = shape
        self._m = n * c
        p8 = _round_up(self._m, _SUBLANE)
        gram_fn = _gram_callable(shape, jnp.dtype(target_feature.dtype).name)
        g = gram_fn(target_feature)
        # Target Gram is fixed ("detached"); padded rows/cols are exactly zero.
        self._target_padded = g[:p8, :p8]
        self.target = self._target_padded[:self._m, :self._m]
        self.loss = None

    def __call__(self, x):
        shape = tuple(int(s) for s in x.shape)
        n, c, _, _ = shape
        if n * c != self._m:
            raise ValueError("input N*C must match the target feature's N*C")
        fn = _loss_callable(shape, jnp.dtype(x.dtype).name)
        self.loss = fn(x, self._target_padded)
        return x  # transparent layer: forward returns its input unchanged

    # PyTorch-style alias
    forward = __call__


# --------------------------------------------------------------------------
# Self-test
# --------------------------------------------------------------------------
if __name__ == "__main__":
    key = jax.random.PRNGKey(0)
    k_tgt, k_in, k_a, k_b = jax.random.split(key, 4)

    # Small NCHW shapes consistent with the module: batch=2, channels=4, 16x16
    N, C, H, W = 2, 4, 16, 16
    target_feature = jax.random.normal(k_tgt, (N, C, H, W), dtype=jnp.float32)
    x = jax.random.normal(k_in, (N, C, H, W), dtype=jnp.float32)

    def ref_gram(t):
        a, b, cc, d = t.shape
        f = t.reshape(a * b, cc * d).astype(jnp.float32)
        g = jnp.matmul(f, f.T, precision=jax.lax.Precision.HIGHEST)
        return g / (a * b * cc * d)

    module = StyleLoss(target_feature)
    out = module(x)
    jax.block_until_ready(out)
    jax.block_until_ready(module.loss)

    ref_loss = jnp.mean((ref_gram(x) - ref_gram(target_feature)) ** 2)
    assert jnp.allclose(out, x), "forward must return its input unchanged"
    assert jnp.allclose(module.loss, ref_loss, rtol=2e-3, atol=1e-6), (
        module.loss, ref_loss)

    # Second call hits the cached jitted pallas_call (no retrace).
    module(x)
    jax.block_until_ready(module.loss)

    # Gram matrix (fused K-tiled path, no masking needed).
    g = gram_matrix(x)
    jax.block_until_ready(g)
    assert jnp.allclose(g, ref_gram(x), rtol=2e-3, atol=1e-5), "gram mismatch"

    # Masking path: N*C not a multiple of 8, H*W not a multiple of the K tile.
    x_odd = jax.random.normal(k_a, (1, 12, 10, 13), dtype=jnp.float32)
    g_odd = gram_matrix(x_odd, _tk_cap=128)
    jax.block_until_ready(g_odd)
    assert jnp.allclose(g_odd, ref_gram(x_odd), rtol=2e-3, atol=1e-5), (
        "masked gram mismatch")

    # M-tiled path (auto-selected for large N*C; forced here at a small size).
    x_big = jax.random.normal(k_b, (1, 250, 10, 13), dtype=jnp.float32)
    g_big = gram_matrix(x_big, _force_tiled=True, _tm=128, _tk_cap=128)
    jax.block_until_ready(g_big)
    assert jnp.allclose(g_big, ref_gram(x_big), rtol=2e-3, atol=1e-5), (
        "tiled gram mismatch")

    # bf16 feature path (halves HBM traffic; MXU still accumulates in f32).
    module_bf16 = StyleLoss(target_feature.astype(jnp.bfloat16))
    module_bf16(x.astype(jnp.bfloat16))
    jax.block_until_ready(module_bf16.loss)
    assert jnp.isfinite(module_bf16.loss)
    assert jnp.allclose(module_bf16.loss, ref_loss, rtol=0.1, atol=1e-5), (
        module_bf16.loss, ref_loss)

    print("KERNEL_OK")
</pallas_src>

<mosaic_0001>
module attributes {stable_mosaic.version = 11 : i64} {
  func.func @_gram_kernel(%arg0: i32, %arg1: memref<8x256xf32, #tpu.memory_space<vmem>>, %arg2: memref<8x8xf32, #tpu.memory_space<vmem>>, %arg3: memref<8x8xf32, #tpu.memory_space<vmem>>) attributes {dimension_semantics = [#tpu.dimension_semantics<arbitrary>], iteration_bounds = array<i64: 1>, scalar_prefetch = 0 : i64, scratch_operands = 1 : i64, tpu.core_type = #tpu.core_type<tc>, window_params = [{transform_indices = @transform_0, window_bounds = array<i64: 8, 256>}, {pipeline_mode = #tpu.pipeline_mode<synchronous>, transform_indices = @transform_1, window_bounds = array<i64: 8, 8>}]} {
    %c0_i32 = arith.constant 0 : i32
    %0 = arith.cmpi eq, %arg0, %c0_i32 : i32
    %1 = arith.extui %0 : i1 to i32
    %c0_i32_0 = arith.constant 0 : i32
    %2 = arith.cmpi ne, %1, %c0_i32_0 : i32
    scf.if %2 {
      %cst_8 = arith.constant 0.000000e+00 : f32
      %11 = vector.broadcast %cst_8 : f32 to vector<8x8xf32>
      %c0_9 = arith.constant 0 : index
      %c0_10 = arith.constant 0 : index
      %12 = vector.load %arg3[%c0_9, %c0_10] : memref<8x8xf32, #tpu.memory_space<vmem>>, vector<8x8xf32>
      tpu.vector_store %arg3[%c0_9, %c0_10], %11 {strides = array<i32>} : memref<8x8xf32, #tpu.memory_space<vmem>>, vector<8x8xf32>,
    } else {
    }
    %c0 = arith.constant 0 : index
    %c0_1 = arith.constant 0 : index
    %3 = vector.load %arg1[%c0, %c0_1] : memref<8x256xf32, #tpu.memory_space<vmem>>, vector<8x256xf32>
    %c0_2 = arith.constant 0 : index
    %c0_3 = arith.constant 0 : index
    %4 = vector.load %arg3[%c0_2, %c0_3] : memref<8x8xf32, #tpu.memory_space<vmem>>, vector<8x8xf32>
    %cst = arith.constant dense<0.000000e+00> : vector<8x8xf32>
    %5 = tpu.matmul %3, %3, %cst {dimension_numbers = #tpu.dot_dimension_numbers<[1], [1], [0], [0], [0, 0, 1, 0], [], []>} : vector<8x256xf32>, vector<8x256xf32>, vector<8x8xf32> -> vector<8x8xf32>
    %6 = arith.addf %4, %5 : vector<8x8xf32>
    %c0_4 = arith.constant 0 : index
    %c0_5 = arith.constant 0 : index
    %7 = vector.load %arg3[%c0_4, %c0_5] : memref<8x8xf32, #tpu.memory_space<vmem>>, vector<8x8xf32>
    tpu.vector_store %arg3[%c0_4, %c0_5], %6 {strides = array<i32>} : memref<8x8xf32, #tpu.memory_space<vmem>>, vector<8x8xf32>,
    %c0_i32_6 = arith.constant 0 : i32
    %8 = arith.cmpi eq, %arg0, %c0_i32_6 : i32
    %9 = arith.extui %8 : i1 to i32
    %c0_i32_7 = arith.constant 0 : i32
    %10 = arith.cmpi ne, %9, %c0_i32_7 : i32
    scf.if %10 {
      %c0_8 = arith.constant 0 : index
      %c0_9 = arith.constant 0 : index
      %11 = vector.load %arg3[%c0_8, %c0_9] : memref<8x8xf32, #tpu.memory_space<vmem>>, vector<8x8xf32>
      %cst_10 = arith.constant 4.8828125E-4 : f32
      %12 = vector.broadcast %cst_10 : f32 to vector<8x8xf32>
      %13 = arith.mulf %11, %12 : vector<8x8xf32>
      %c0_11 = arith.constant 0 : index
      %c0_12 = arith.constant 0 : index
      %14 = vector.load %arg2[%c0_11, %c0_12] : memref<8x8xf32, #tpu.memory_space<vmem>>, vector<8x8xf32>
      tpu.vector_store %arg2[%c0_11, %c0_12], %13 {strides = array<i32>} : memref<8x8xf32, #tpu.memory_space<vmem>>, vector<8x8xf32>,
    } else {
    }
    return
  }
  func.func @transform_0(%arg0: i32) -> (i32, i32) {
    %c0_i32 = arith.constant 0 : i32
    %c0_i32_0 = arith.constant 0 : i32
    return %c0_i32, %arg0 : i32, i32
  }
  func.func @transform_1(%arg0: i32) -> (i32, i32) {
    %c0_i32 = arith.constant 0 : i32
    %c0_i32_0 = arith.constant 0 : i32
    %c0_i32_1 = arith.constant 0 : i32
    return %c0_i32, %c0_i32_0 : i32, i32
  }
}

</mosaic_0001>

<bundles_post_ra>
// kernel: fn.1
= control target key start
LH: loop header
LB: loop body
LE: loop exit
PB: predicated region body
PF: predicated region fallthrough
CT: control target
= control target key end

     0   :  { %vm13_vm0 = vcmask 64512   ;;  %s170_s0 = inlined_call_operand.vmem [shape: f32[8,256], index: 0, kind: input, shape index: {}]   ;;  %s171_s1 = inlined_call_operand.hbm [shape: f32[8,8], index: 1, kind: output, shape index: {}]  }
   0x1   :  { %v16_v0 = vld [vmem:[%s170_s0 + $0x8] sm:$0xff]  ;;  %v15_v1 = vld [vmem:[%s170_s0] sm:$0xff] }
   0x2   :  { %6 = vsyncpa [#allocation4], 0  ;;  %18 = vmatprep.subr.mxu0 %v16_v0  ;;  %82 = vmatprep.mubr.f32.mxu0 %v16_v0  ;;  %v137_v2 = vmov 0.0   ;;  %s138_s10 = smov [#allocation3]  }
   0x3   :  { %14 = vst.msk [vmem:[#allocation2] sm:$0xff] %vm13_vm0, %v137_v2  ;;  %19 = vmatpush1.xpose.msra.mxu0 %v15_v1  ;;  %s103_s11 = sshll.u32 %s138_s10, 4  ;;  %s104_s11 = int_to_ptr.vmem [resolvable:$true] %s103_s11 }
   0x4   :  { %s113_s0 = scalar_lea.vmem %s104_s11, 128  ;;  %p118_p1 = scmp.lt.s32.totalorder %s104_s11, %s104_s11 }
   0x5   :  { %p114_p0 = scmp.ne.s32.totalorder %s104_s11, %s113_s0  ;;  %p119_p2 = scmp.lt.s32.totalorder %s113_s0, %s113_s0 }
   0x6   :  { %83 = vmatmul.mubr.f32.vlgmr.msra.gmra.mrb[0].mxu0 %v15_v1 }
   0x7   :  { %p120_p3 = por %p119_p2, %p118_p1 }
   0x9   :  { %p121_p4 = pnand %p120_p3, %p114_p0 }
   0xa   :  { %v17_v3 = vld [vmem:[#allocation2] sm:$0xff] }
  0xd9   :  { %v84_v4 = vpop.f32.mrb[0].mxu0 }
  0xda   :  { %v88_v5 = vadd.f32 %v84_v4, %v17_v3  ;;  %v86_v6 = vpop.f32.mrb[1].mxu0 }
  0xdc   :  { %90 = vst.msk [vmem:[#allocation2] sm:$0xff] %vm13_vm0, %v88_v5 }
  0xe3   :  { %v94_v7 = vld [vmem:[#allocation2] sm:$0xff] }
  0xe4   :  { %v95_v8 = vmul.f32 0.00048828125, %v94_v7 }
  0xe6   :  { %96 = vst.msk [vmem:[#allocation3] sm:$0xff] %vm13_vm0, %v95_v8 }
  0xe7   :  { %124 = shalt.err (!%p121_p4)
}
  0xe8   :  { %s125_s14 = scalar_lea.hbm %s171_s1, 128 }
  0xe9   :  { %p126_p5 = scmp.ne.s32.totalorder %s171_s1, %s125_s14  ;;  %p129_p6 = scmp.lt.u32.totalorder %s125_s14, %s171_s1 }
  0xeb   :  { %p131_p7 = pnand %p129_p6, %p126_p5 }
  0xed   :  { %134 = shalt.err (!%p131_p7)
}
  0xee   :  { %106 = dma.vmem_to_hbm [thread:$0]  %s104_s11, 128, %s171_s1, [#allocation4]  }
  0xef   :  { %135 = dma.done.wait [#allocation4], 128  }
  0xf0   :  { %136 = vsyncadd [#allocation4], 4294967168 }
  0xf1   :  { %110 = vsyncpa [#allocation4], 1 }

</bundles_post_ra>
